<compile_context>
chip_gen: v7x
topology: tpu7x:2x2x1
jax: 0.10.0
libtpu: 0.0.40
codegen_flags: <defaults>
</compile_context>

<pallas_src>
import jax
import jax.numpy as jnp
import numpy as np
from jax.experimental import pallas as pl
from jax.experimental.pallas import tpu as pltpu


def _round_up(x, m):
    return ((x + m - 1) // m) * m


def _fused_mlp3_kernel(x_ref, w1_ref, w2_ref, w3_ref, o_ref):
    # Single kernel step; all networks handled via the leading batch dim of the
    # batched dot_generals (MXU).  Biases are already folded into the weights
    # (ones-column in x / bias-row in w), so the body is just matmul + ReLU.
    x = x_ref[...]                                                    # (N, M_pad, 128)
    h = jnp.einsum('nmk,nkh->nmh', x, w1_ref[...],
                   preferred_element_type=jnp.float32)
    h = jnp.maximum(h, 0.0)
    h = jnp.einsum('nmk,nkh->nmh', h, w2_ref[...],
                   preferred_element_type=jnp.float32)
    h = jnp.maximum(h, 0.0)
    o_ref[...] = jnp.einsum('nmk,nkh->nmh', h, w3_ref[...],
                            preferred_element_type=jnp.float32)


def fused_mlp3_forward(x_stack, w1_aug, w2_aug, w3_aug):
    """x_stack: (N, M_pad, d_in_aug) -> (N, M_pad, d_out_pad) in ONE kernel step.

    No grid: whole arrays live in VMEM (a few hundred KB total at these sizes),
    so there is zero per-step pipeline overhead.
    # TODO(synk): at production batch/seq sizes add an M-row grid axis (>=512-row
    # tiles, weights resident via index_map (0,0,0)) and cast x/weights to bf16;
    # on v7x mark a network/core axis CORE_PARALLEL to use both TensorCores.
    """
    N, M_pad, d_in_aug = x_stack.shape
    d_h1_aug = w1_aug.shape[2]
    d_h2_aug = w2_aug.shape[2]
    d_out_pad = w3_aug.shape[2]

    flops = 2 * N * M_pad * (d_in_aug * d_h1_aug
                             + d_h1_aug * d_h2_aug
                             + d_h2_aug * d_out_pad)
    bytes_accessed = 4 * (x_stack.size + w1_aug.size + w2_aug.size
                          + w3_aug.size + N * M_pad * d_out_pad)

    def vmem():
        return pl.BlockSpec(memory_space=pltpu.MemorySpace.VMEM)

    return pl.pallas_call(
        _fused_mlp3_kernel,
        out_shape=jax.ShapeDtypeStruct((N, M_pad, d_out_pad), jnp.float32),
        in_specs=[vmem(), vmem(), vmem(), vmem()],
        out_specs=vmem(),
        cost_estimate=pl.CostEstimate(flops=int(flops), transcendentals=0,
                                      bytes_accessed=int(bytes_accessed)),
    )(x_stack, w1_aug, w2_aug, w3_aug)


class MultiAgentSharedNetworkPallas:
    """JAX/Pallas port of MultiAgentSharedNetwork (use_rnn=False, 2 hidden layers)."""

    def __init__(self, input_sizes, hidden_dims, output_sizes, sharing_indices, key):
        assert len(input_sizes) == len(output_sizes)
        assert len(hidden_dims) == 2, "Pallas port implements the 3-layer MLP path"
        self.num_agents = len(input_sizes)
        if sharing_indices is True:
            self.sharing_indices = self.num_agents * [0]
        elif sharing_indices is False:
            self.sharing_indices = list(range(self.num_agents))
        else:
            self.sharing_indices = list(sharing_indices)
        assert len(self.sharing_indices) == self.num_agents

        self.num_networks = 0
        self.network_params = []      # unpadded, for reference / inspection
        self.agents_by_network = []
        self.net_in_sizes = []
        self.net_out_sizes = []
        created = set()
        ortho = jax.nn.initializers.orthogonal()
        for i in self.sharing_indices:
            if i in created:
                continue
            agents = [j for j, idx in enumerate(self.sharing_indices) if idx == i]
            in_sizes = [input_sizes[j] for j in agents]
            out_sizes = [output_sizes[j] for j in agents]
            assert all(d == in_sizes[0] for d in in_sizes)
            assert all(d == out_sizes[0] for d in out_sizes)
            dims = [in_sizes[0]] + list(hidden_dims) + [out_sizes[0]]
            params = []
            for d_in, d_out in zip(dims[:-1], dims[1:]):
                key, wk = jax.random.split(key)
                # TODO(synk): torch nn.Linear default init is Kaiming-uniform; the
                # spec defaults to use_orthogonal_init=True, which is what we mirror.
                w = ortho(wk, (d_in, d_out), jnp.float32)
                b = jnp.zeros((d_out,), jnp.float32)
                params.append((w, b))
            self.network_params.append(tuple(params))
            self.agents_by_network.append(agents)
            self.net_in_sizes.append(in_sizes[0])
            self.net_out_sizes.append(out_sizes[0])
            self.num_networks += 1
            created.add(i)

        # --- Build stacked, lane-dense, bias-folded weight slabs (once). ---
        N = self.num_networks
        d_h1, d_h2 = hidden_dims
        self.d_h1, self.d_h2 = d_h1, d_h2
        # "ones" column positions (shared across networks); everything padded to 128.
        self.ones_col_x = max(self.net_in_sizes)
        self.ones_col_h1 = d_h1
        self.ones_col_h2 = d_h2
        self.d_in_aug = _round_up(self.ones_col_x + 1, 128)
        self.d_h1_aug = _round_up(d_h1 + 1, 128)
        self.d_h2_aug = _round_up(d_h2 + 1, 128)
        self.d_out_pad = _round_up(max(self.net_out_sizes), 128)

        w1_aug = np.zeros((N, self.d_in_aug, self.d_h1_aug), np.float32)
        w2_aug = np.zeros((N, self.d_h1_aug, self.d_h2_aug), np.float32)
        w3_aug = np.zeros((N, self.d_h2_aug, self.d_out_pad), np.float32)
        for n, params in enumerate(self.network_params):
            (w1, b1), (w2, b2), (w3, b3) = params
            d_in = self.net_in_sizes[n]
            d_out = self.net_out_sizes[n]
            # Layer 1: rows [0:d_in] = w1, row ones_col_x = b1, plus a 1 that
            # regenerates the ones column in h1.
            w1_aug[n, :d_in, :d_h1] = np.asarray(w1)
            w1_aug[n, self.ones_col_x, :d_h1] = np.asarray(b1)
            w1_aug[n, self.ones_col_x, self.ones_col_h1] = 1.0
            # Layer 2.
            w2_aug[n, :d_h1, :d_h2] = np.asarray(w2)
            w2_aug[n, self.ones_col_h1, :d_h2] = np.asarray(b2)
            w2_aug[n, self.ones_col_h1, self.ones_col_h2] = 1.0
            # Layer 3 (output; no ones column needed downstream).
            w3_aug[n, :d_h2, :d_out] = np.asarray(w3)
            w3_aug[n, self.ones_col_h2, :d_out] = np.asarray(b3)
        self.w1_aug = jnp.asarray(w1_aug)
        self.w2_aug = jnp.asarray(w2_aug)
        self.w3_aug = jnp.asarray(w3_aug)

        # Whole forward (glue + kernel + per-agent slicing) under one jit.
        self._forward = jax.jit(self._forward_impl)

    def _forward_impl(self, inputs, w1_aug, w2_aug, w3_aug):
        S = inputs[0].shape[0]
        B = inputs[0].shape[1]
        N = self.num_networks
        m_per_net = [S * len(agents) * B for agents in self.agents_by_network]
        M_pad = _round_up(max(m_per_net), 8)

        # One pre-allocated stacked buffer; per-network slice updates only.
        x_stack = jnp.zeros((N, M_pad, self.d_in_aug), jnp.float32)
        x_stack = x_stack.at[:, :, self.ones_col_x].set(1.0)   # bias "ones" column
        for n, agents in enumerate(self.agents_by_network):
            d_in = self.net_in_sizes[n]
            net_in = jnp.concatenate([inputs[j] for j in agents], axis=1)   # (S, nA*B, d_in)
            x2d = net_in.reshape(m_per_net[n], d_in).astype(jnp.float32)
            x_stack = x_stack.at[n, :m_per_net[n], :d_in].set(x2d)

        # Single fused launch for every shared network.
        y_stack = fused_mlp3_forward(x_stack, w1_aug, w2_aug, w3_aug)

        # Slice back per agent (static slicing, fused under the same jit).
        outs = []
        for n, agents in enumerate(self.agents_by_network):
            d_out = self.net_out_sizes[n]
            nA = len(agents)
            y = y_stack[n, :m_per_net[n], :d_out].reshape(S, nA * B, d_out)
            outs.append([y[:, k * B:(k + 1) * B, :] for k in range(nA)])

        agent_outputs = []
        idx_by_network = [0] * self.num_networks
        for network_idx in self.sharing_indices:
            k = idx_by_network[network_idx]
            agent_outputs.append(outs[network_idx][k])
            idx_by_network[network_idx] += 1
        return tuple(agent_outputs)

    def __call__(self, inputs, hiddens=None):
        # TODO(synk): use_rnn=True (GRU hidden-state path) is not implemented; this
        # covers the default MLP path where all hiddens are None.
        assert all(x.ndim == 3 for x in inputs)
        assert hiddens is None or all(h is None for h in hiddens)
        B = inputs[0].shape[1]
        assert all(x.shape[1] == B for x in inputs)
        agent_outputs = list(self._forward(tuple(inputs), self.w1_aug,
                                           self.w2_aug, self.w3_aug))
        agent_hiddens = [None] * self.num_agents
        return agent_outputs, agent_hiddens


def _ref_mlp(x2d, params):
    (w1, b1), (w2, b2), (w3, b3) = params
    h = jnp.maximum(x2d @ w1 + b1, 0.0)
    h = jnp.maximum(h @ w2 + b2, 0.0)
    return h @ w3 + b3


if __name__ == "__main__":
    key = jax.random.PRNGKey(0)

    # simple_tag-like setup: 3 adversaries share network 0, 1 prey uses network 1.
    input_sizes = [16, 16, 16, 14]
    output_sizes = [5, 5, 5, 5]
    hidden_dims = [32, 32]
    sharing_indices = [0, 0, 0, 1]
    seq_len, batch = 8, 2

    key, k_net = jax.random.split(key)
    net = MultiAgentSharedNetworkPallas(
        input_sizes, hidden_dims, output_sizes, sharing_indices, k_net)

    inputs = []
    for d in input_sizes:
        key, kx = jax.random.split(key)
        inputs.append(jax.random.normal(kx, (seq_len, batch, d), jnp.float32))

    agent_outputs, agent_hiddens = net(inputs)
    agent_outputs = [jax.block_until_ready(o) for o in agent_outputs]

    # Correctness check against a pure-JAX reference of the same (unpadded) MLPs.
    net_of_agent = {}
    for n_idx, agents in enumerate(net.agents_by_network):
        for a in agents:
            net_of_agent[a] = n_idx
    for a in range(len(input_sizes)):
        params = net.network_params[net_of_agent[a]]
        x2d = inputs[a].reshape(seq_len * batch, input_sizes[a])
        ref = _ref_mlp(x2d, params).reshape(seq_len, batch, output_sizes[a])
        assert agent_outputs[a].shape == (seq_len, batch, output_sizes[a])
        np.testing.assert_allclose(np.asarray(agent_outputs[a]),
                                   np.asarray(ref), rtol=1e-5, atol=1e-5)
    assert all(h is None for h in agent_hiddens)

    print("KERNEL_OK")
</pallas_src>

<mosaic_0001>
module attributes {stable_mosaic.version = 11 : i64} {
  func.func @_fused_mlp3_kernel(%arg0: memref<2x48x128xf32, #tpu.memory_space<vmem>>, %arg1: memref<2x128x128xf32, #tpu.memory_space<vmem>>, %arg2: memref<2x128x128xf32, #tpu.memory_space<vmem>>, %arg3: memref<2x128x128xf32, #tpu.memory_space<vmem>>, %arg4: memref<2x48x128xf32, #tpu.memory_space<vmem>>) attributes {dimension_semantics = [], scalar_prefetch = 0 : i64, scratch_operands = 0 : i64, tpu.core_type = #tpu.core_type<tc>} {
    %c0 = arith.constant 0 : index
    %c0_0 = arith.constant 0 : index
    %c0_1 = arith.constant 0 : index
    %0 = vector.load %arg0[%c0, %c0_0, %c0_1] : memref<2x48x128xf32, #tpu.memory_space<vmem>>, vector<2x48x128xf32>
    %c0_2 = arith.constant 0 : index
    %c0_3 = arith.constant 0 : index
    %c0_4 = arith.constant 0 : index
    %1 = vector.load %arg1[%c0_2, %c0_3, %c0_4] : memref<2x128x128xf32, #tpu.memory_space<vmem>>, vector<2x128x128xf32>
    "tpu.trace_start"() <{level = 10 : i32, message = "nmk,nkh->nmh"}> : () -> ()
    %cst = arith.constant dense<0.000000e+00> : vector<2x48x128xf32>
    %2 = tpu.matmul %0, %1, %cst {dimension_numbers = #tpu.dot_dimension_numbers<[2], [1], [1], [2], [0, 0, 0, 1, 1, 2], [0], [0]>} : vector<2x48x128xf32>, vector<2x128x128xf32>, vector<2x48x128xf32> -> vector<2x48x128xf32>
    "tpu.trace_stop"() : () -> ()
    %cst_5 = arith.constant 0.000000e+00 : f32
    %3 = vector.broadcast %cst_5 : f32 to vector<2x48x128xf32>
    %4 = arith.maximumf %2, %3 : vector<2x48x128xf32>
    %c0_6 = arith.constant 0 : index
    %c0_7 = arith.constant 0 : index
    %c0_8 = arith.constant 0 : index
    %5 = vector.load %arg2[%c0_6, %c0_7, %c0_8] : memref<2x128x128xf32, #tpu.memory_space<vmem>>, vector<2x128x128xf32>
    "tpu.trace_start"() <{level = 10 : i32, message = "nmk,nkh->nmh"}> : () -> ()
    %cst_9 = arith.constant dense<0.000000e+00> : vector<2x48x128xf32>
    %6 = tpu.matmul %4, %5, %cst_9 {dimension_numbers = #tpu.dot_dimension_numbers<[2], [1], [1], [2], [0, 0, 0, 1, 1, 2], [0], [0]>} : vector<2x48x128xf32>, vector<2x128x128xf32>, vector<2x48x128xf32> -> vector<2x48x128xf32>
    "tpu.trace_stop"() : () -> ()
    %cst_10 = arith.constant 0.000000e+00 : f32
    %7 = vector.broadcast %cst_10 : f32 to vector<2x48x128xf32>
    %8 = arith.maximumf %6, %7 : vector<2x48x128xf32>
    %c0_11 = arith.constant 0 : index
    %c0_12 = arith.constant 0 : index
    %c0_13 = arith.constant 0 : index
    %9 = vector.load %arg3[%c0_11, %c0_12, %c0_13] : memref<2x128x128xf32, #tpu.memory_space<vmem>>, vector<2x128x128xf32>
    "tpu.trace_start"() <{level = 10 : i32, message = "nmk,nkh->nmh"}> : () -> ()
    %cst_14 = arith.constant dense<0.000000e+00> : vector<2x48x128xf32>
    %10 = tpu.matmul %8, %9, %cst_14 {dimension_numbers = #tpu.dot_dimension_numbers<[2], [1], [1], [2], [0, 0, 0, 1, 1, 2], [0], [0]>} : vector<2x48x128xf32>, vector<2x128x128xf32>, vector<2x48x128xf32> -> vector<2x48x128xf32>
    "tpu.trace_stop"() : () -> ()
    %c0_15 = arith.constant 0 : index
    %c0_16 = arith.constant 0 : index
    %c0_17 = arith.constant 0 : index
    %11 = vector.load %arg4[%c0_15, %c0_16, %c0_17] : memref<2x48x128xf32, #tpu.memory_space<vmem>>, vector<2x48x128xf32>
    tpu.vector_store %arg4[%c0_15, %c0_16, %c0_17], %10 {strides = array<i32>} : memref<2x48x128xf32, #tpu.memory_space<vmem>>, vector<2x48x128xf32>,
    return
  }
}

</mosaic_0001>

<bundles_post_ra>
// kernel: squeeze.2
= control target key start
LH: loop header
LB: loop body
LE: loop exit
PB: predicated region body
PF: predicated region fallthrough
CT: control target
= control target key end

     0   :  { %vm3_vm0 = vcmask 48128   ;;  %s85_s12 = smov 122   ;;  %s86_s13 = smov 110   ;;  %s190_s0 = inlined_call_operand.vmem [shape: f32[1,48,5], index: 0, kind: input, shape index: {}]   ;;  %s191_s1 = inlined_call_operand.vmem [shape: f32[8,6,5], index: 1, kind: output, shape index: {}]  }
   0x1   :  { %v7_v0 = vld [vmem:[%s190_s0] sm:$0x1f]   ;;  %s87_s22 = smov 116   ;;  %s88_s23 = smov 104  }
   0x2   :  { %v23_v1 = vld [vmem:[%s190_s0] sm:$0x1f]   ;;  %8 = vrot.lane.b32.xlu0 %v7_v0, %s85_s12  ;;  %s89_s28 = smov 98   ;;  %s90_s29 = smov 92  }
   0x3   :  { %v2_v2 = vld [vmem:[%s190_s0] sm:$0x1f]   ;;  %24 = vrot.lane.b32.xlu1 %v23_v1, %s86_s13 }
   0x4   :  { %4 = vst.msk [vmem:[%s191_s1] ss:$8 sm:$0xf] %vm3_vm0, %v2_v2   ;;  %63 = vst.msk [vmem:[%s191_s1 + $0x1c] sm:$0x10] %vm3_vm0, %v2_v2  }
   0x5   :  { %v15_v3 = vld [vmem:[%s190_s0] sm:$0x1f]  }
   0x6   :  { %v31_v4 = vld [vmem:[%s190_s0] sm:$0x1f]   ;;  %16 = vrot.lane.b32.xlu0 %v15_v3, %s87_s22 }
   0x7   :  { %32 = vrot.lane.b32.xlu1 %v31_v4, %s88_s23  ;;  %v39_v5 = vld [vmem:[%s190_s0] sm:$0x1f]  }
   0x8   :  { %v47_v6 = vld [vmem:[%s190_s0] sm:$0x1f]  }
   0x9   :  { %v55_v7 = vld [vmem:[%s190_s0] sm:$0x1f]   ;;  %s91_s0 = smov 86  }
   0xa   :  { %40 = vrot.lane.b32.xlu0 %v39_v5, %s89_s28 }
   0xb   :  { %48 = vrot.lane.b32.xlu1 %v47_v6, %s90_s29 }
   0xe   :  { %56 = vrot.lane.b32.xlu0 %v55_v7, %s91_s0 }
  0x74   :  { %v9_v8 = vpop.permute.xlu0 %8  }
  0x75   :  { %v25_v9 = vpop.permute.xlu1 %24   ;;  %64 = vst.msk [vmem:[%s191_s1 + $0x1] ss:$8 sm:$0xf] %vm3_vm0, %v9_v8   ;;  %65 = vst.msk [vmem:[%s191_s1 + $0x1d] sm:$0x10] %vm3_vm0, %v9_v8  }
  0x76   :  { %68 = vst.msk [vmem:[%s191_s1 + $0x3] ss:$8 sm:$0xf] %vm3_vm0, %v25_v9   ;;  %69 = vst.msk [vmem:[%s191_s1 + $0x1f] sm:$0x10] %vm3_vm0, %v25_v9  }
  0x78   :  { %v17_v10 = vpop.permute.xlu0 %16  }
  0x79   :  { %v33_v11 = vpop.permute.xlu1 %32   ;;  %66 = vst.msk [vmem:[%s191_s1 + $0x2] ss:$8 sm:$0xf] %vm3_vm0, %v17_v10   ;;  %67 = vst.msk [vmem:[%s191_s1 + $0x1e] sm:$0x10] %vm3_vm0, %v17_v10  }
  0x7a   :  { %70 = vst.msk [vmem:[%s191_s1 + $0x4] ss:$8 sm:$0xf] %vm3_vm0, %v33_v11   ;;  %71 = vst.msk [vmem:[%s191_s1 + $0x20] sm:$0x10] %vm3_vm0, %v33_v11  }
  0x7c   :  { %v41_v12 = vpop.permute.xlu0 %40  }
  0x7d   :  { %v49_v13 = vpop.permute.xlu1 %48   ;;  %72 = vst.msk [vmem:[%s191_s1 + $0x5] ss:$8 sm:$0xf] %vm3_vm0, %v41_v12   ;;  %73 = vst.msk [vmem:[%s191_s1 + $0x21] sm:$0x10] %vm3_vm0, %v41_v12  }
  0x7e   :  { %74 = vst.msk [vmem:[%s191_s1 + $0x6] ss:$8 sm:$0xf] %vm3_vm0, %v49_v13   ;;  %75 = vst.msk [vmem:[%s191_s1 + $0x22] sm:$0x10] %vm3_vm0, %v49_v13  }
  0x80   :  { %v57_v14 = vpop.permute.xlu0 %56  }
  0x81   :  { %76 = vst.msk [vmem:[%s191_s1 + $0x7] ss:$8 sm:$0xf] %vm3_vm0, %v57_v14   ;;  %77 = vst.msk [vmem:[%s191_s1 + $0x23] sm:$0x10] %vm3_vm0, %v57_v14  }

// kernel: _forward_impl.1
= control target key start
LH: loop header
LB: loop body
LE: loop exit
PB: predicated region body
PF: predicated region fallthrough
CT: control target
= control target key end

     0   :  { %9 = vsyncpa [#allocation3], 0  ;;  %s1608_s0 = inlined_call_operand.vmem [shape: f32[2,48,128], index: 0, kind: input, shape index: {}]   ;;  %s1609_s1 = inlined_call_operand.vmem [shape: f32[2,128,128], index: 1, kind: input, shape index: {}]   ;;  %s1610_s2 = inlined_call_operand.hbm [shape: f32[2,128,128], index: 2, kind: input, shape index: {}]   ;;  %s1611_s3 = inlined_call_operand.hbm [shape: f32[2,128,128], index: 3, kind: input, shape index: {}]   ;;  %s1612_s4 = inlined_call_operand.vmem [shape: f32[2,48,128], index: 4, kind: output, shape index: {}]  }
   0x1   :  { %10 = vsyncpa [#allocation5], 0  ;;  %s1387_s15 = smov [#allocation2]   ;;  %s1339_s19 = scalar_lea.hbm %s1610_s2, 4096 }
   0x2   :  { %s20_s16 = sshll.u32 %s1387_s15, 4  ;;  %p1340_p0 = scmp.ne.s32.totalorder %s1610_s2, %s1339_s19  ;;  %s21_s16 = int_to_ptr.vmem [resolvable:$true] %s20_s16 }
   0x3   :  { %p1343_p1 = scmp.lt.u32.totalorder %s1339_s19, %s1610_s2 }
   0x5   :  { %p1345_p2 = pnand %p1343_p1, %p1340_p0 }
   0x7   :  { %1348 = shalt.err (!%p1345_p2)
}
   0x8   :  { %s1349_s24 = scalar_lea.vmem %s21_s16, 4096  ;;  %p1354_p4 = scmp.lt.s32.totalorder %s21_s16, %s21_s16 }
   0x9   :  { %p1350_p3 = scmp.ne.s32.totalorder %s21_s16, %s1349_s24  ;;  %p1355_p5 = scmp.lt.s32.totalorder %s1349_s24, %s1349_s24 }
   0xb   :  { %p1356_p6 = por %p1355_p5, %p1354_p4 }
   0xd   :  { %p1357_p7 = pnand %p1356_p6, %p1350_p3 }
   0xf   :  { %1360 = shalt.err (!%p1357_p7)
}
  0x10   :  { %s1388_s25 = smov 128   ;;  %s1389_s26 = smov 8  }
  0x11   :  { %26 = dma.hbm_to_vmem [thread:$0]  %s1610_s2, 4096, %s21_s16, [#allocation3], %s1388_s25, %s1388_s25, %s1389_s26  }
  0x12   :  { %s1390_s29 = smov [#allocation4]   ;;  %s1361_s7 = scalar_lea.hbm %s1611_s3, 4096 }
  0x13   :  { %s32_s30 = sshll.u32 %s1390_s29, 4  ;;  %p1362_p8 = scmp.ne.s32.totalorder %s1611_s3, %s1361_s7  ;;  %s33_s30 = int_to_ptr.vmem [resolvable:$true] %s32_s30 }
  0x14   :  { %p1365_p9 = scmp.lt.u32.totalorder %s1361_s7, %s1611_s3 }
  0x16   :  { %p1367_p10 = pnand %p1365_p9, %p1362_p8 }
  0x18   :  { %1370 = shalt.err (!%p1367_p10)
}
  0x19   :  { %s1371_s12 = scalar_lea.vmem %s33_s30, 4096  ;;  %p1376_p12 = scmp.lt.s32.totalorder %s33_s30, %s33_s30 }
  0x1a   :  { %p1372_p11 = scmp.ne.s32.totalorder %s33_s30, %s1371_s12  ;;  %p1377_p13 = scmp.lt.s32.totalorder %s1371_s12, %s1371_s12 }
  0x1c   :  { %p1378_p0 = por %p1377_p13, %p1376_p12 }
  0x1e   :  { %p1379_p1 = pnand %p1378_p0, %p1372_p11 }
  0x20   :  { %1382 = shalt.err (!%p1379_p1)
}
  0x21   :  { %38 = dma.hbm_to_vmem [thread:$0]  %s1611_s3, 4096, %s33_s30, [#allocation5], %s1388_s25, %s1388_s25, %s1389_s26  }
  0x22   :  { %1383 = dma.done.wait [#allocation3], 4096  }
  0x23   :  { %1384 = vsyncadd [#allocation3], 4294963200 }
  0x24   :  { %1385 = dma.done.wait [#allocation5], 4096  }
  0x25   :  { %1386 = vsyncadd [#allocation5], 4294963200  ;;  %v57_v0 = vld [vmem:[%s1609_s1] sm:$0xff]  ;;  %v58_v1 = vld [vmem:[%s1609_s1 + $0x8] sm:$0xff] }
  0x26   :  { %v73_v2 = vld [vmem:[%s1609_s1 + $0x80] sm:$0xff]  ;;  %v1143_v3 = vpack.c.bf16 %v58_v1, %v57_v0  ;;  %v74_v4 = vld [vmem:[%s1609_s1 + $0x88] sm:$0xff]  ;;  %v59_v5 = vld [vmem:[%s1609_s1 + $0x10] sm:$0xff] }
  0x27   :  { %v60_v6 = vld [vmem:[%s1609_s1 + $0x18] sm:$0xff]  ;;  %v1175_v7 = vpack.c.bf16 %v74_v4, %v73_v2  ;;  %v75_v9 = vld [vmem:[%s1609_s1 + $0x90] sm:$0xff]  ;;  %v61_v11 = vld [vmem:[%s1609_s1 + $0x20] sm:$0xff] }
  0x28   :  { %v1147_v8 = vpack.c.bf16 %v60_v6, %v59_v5  ;;  %v76_v10 = vld [vmem:[%s1609_s1 + $0x98] sm:$0xff]  ;;  %1144 = vmatprep.subr.bf16.mxu0 %v1143_v3  ;;  %v62_v13 = vld [vmem:[%s1609_s1 + $0x28] sm:$0xff]  ;;  %v77_v14 = vld [vmem:[%s1609_s1 + $0xa0] sm:$0xff] }
  0x29   :  { %v1179_v12 = vpack.c.bf16 %v76_v10, %v75_v9  ;;  %v78_v15 = vld [vmem:[%s1609_s1 + $0xa8] sm:$0xff]  ;;  %1176 = vmatprep.subr.bf16.mxu1 %v1175_v7  ;;  %1146 = vmatpush3.bf16.msra.mxu0 %v1143_v3  ;;  %v1151_v16 = vpack.c.bf16 %v62_v13, %v61_v11  ;;  %v63_v18 = vld [vmem:[%s1609_s1 + $0x30] sm:$0xff]  ;;  %v64_v19 = vld [vmem:[%s1609_s1 + $0x38] sm:$0xff] }
  0x2a   :  { %1178 = vmatpush3.bf16.msra.mxu1 %v1175_v7  ;;  %1148 = vmatprep.subr.bf16.mxu0 %v1147_v8  ;;  %v1183_v17 = vpack.c.bf16 %v78_v15, %v77_v14  ;;  %v79_v20 = vld [vmem:[%s1609_s1 + $0xb0] sm:$0xff]  ;;  %v80_v21 = vld [vmem:[%s1609_s1 + $0xb8] sm:$0xff]  ;;  %v1155_v22 = vpack.c.bf16 %v64_v19, %v63_v18  ;;  %v65_v24 = vld [vmem:[%s1609_s1 + $0x40] sm:$0xff] }
  0x2b   :  { %1180 = vmatprep.subr.bf16.mxu1 %v1179_v12  ;;  %v1187_v23 = vpack.c.bf16 %v80_v21, %v79_v20  ;;  %v66_v25 = vld [vmem:[%s1609_s1 + $0x48] sm:$0xff]  ;;  %v45_v26 = vld [vmem:[%s1608_s0] sm:$0xff]  ;;  %v51_v29 = vld [vmem:[%s1608_s0 + $0x30] sm:$0xff] }
  0x2c   :  { %v81_v27 = vld [vmem:[%s1609_s1 + $0xc0] sm:$0xff]  ;;  %v82_v28 = vld [vmem:[%s1609_s1 + $0xc8] sm:$0xff]  ;;  %929 = vmatprep.mubr.f32.mxu0 %v45_v26  ;;  %970 = vmatprep.mubr.f32.mxu1 %v51_v29  ;;  %v1159_v30 = vpack.c.bf16 %v66_v25, %v65_v24  ;;  %v67_v32 = vld [vmem:[%s1609_s1 + $0x50] sm:$0xff] }
  0x2d   :  { %1150 = vmatpush3.bf16.msra.mxu0 %v1147_v8  ;;  %v1191_v31 = vpack.c.bf16 %v82_v28, %v81_v27  ;;  %v68_v33 = vld [vmem:[%s1609_s1 + $0x58] sm:$0xff]  ;;  %v83_v34 = vld [vmem:[%s1609_s1 + $0xd0] sm:$0xff]  ;;  %v69_v38 = vld [vmem:[%s1609_s1 + $0x60] sm:$0xff] }
  0x2e   :  { %1182 = vmatpush3.bf16.msra.mxu1 %v1179_v12  ;;  %1152 = vmatprep.subr.bf16.mxu0 %v1151_v16  ;;  %v84_v35 = vld [vmem:[%s1609_s1 + $0xd8] sm:$0xff]  ;;  %v1163_v36 = vpack.c.bf16 %v68_v33, %v67_v32  ;;  %v70_v39 = vld [vmem:[%s1609_s1 + $0x68] sm:$0xff]  ;;  %v85_v40 = vld [vmem:[%s1609_s1 + $0xe0] sm:$0xff] }
  0x2f   :  { %1184 = vmatprep.subr.bf16.mxu1 %v1183_v17  ;;  %v1195_v37 = vpack.c.bf16 %v84_v35, %v83_v34  ;;  %v86_v41 = vld [vmem:[%s1609_s1 + $0xe8] sm:$0xff]  ;;  %v1167_v42 = vpack.c.bf16 %v70_v39, %v69_v38  ;;  %v71_v44 = vld [vmem:[%s1609_s1 + $0x70] sm:$0xff]  ;;  %v72_v45 = vld [vmem:[%s1609_s1 + $0x78] sm:$0xff] }
  0x30   :  { %v1199_v43 = vpack.c.bf16 %v86_v41, %v85_v40  ;;  %v87_v46 = vld [vmem:[%s1609_s1 + $0xf0] sm:$0xff]  ;;  %v88_v47 = vld [vmem:[%s1609_s1 + $0xf8] sm:$0xff]  ;;  %v1171_v48 = vpack.c.bf16 %v72_v45, %v71_v44  ;;  %v291_v50 = vld [vmem:[#allocation2] sm:$0xff] }
  0x31   :  { %1154 = vmatpush3.bf16.msra.mxu0 %v1151_v16  ;;  %v1203_v49 = vpack.c.bf16 %v88_v47, %v87_v46  ;;  %v292_v51 = vld [vmem:[#allocation2 + $0x8] sm:$0xff]  ;;  %v307_v52 = vld [vmem:[#allocation2 + $0x80] sm:$0xff]  ;;  %v293_v56 = vld [vmem:[#allocation2 + $0x10] sm:$0xff] }
  0x32   :  { %1186 = vmatpush3.bf16.msra.mxu1 %v1183_v17  ;;  %1156 = vmatprep.subr.bf16.mxu0 %v1155_v22  ;;  %v308_v53 = vld [vmem:[#allocation2 + $0x88] sm:$0xff]  ;;  %v1207_v54 = vpack.c.bf16 %v292_v51, %v291_v50  ;;  %v294_v57 = vld [vmem:[#allocation2 + $0x18] sm:$0xff]  ;;  %v309_v59 = vld [vmem:[#allocation2 + $0x90] sm:$0xff] }
  0x33   :  { %1188 = vmatprep.subr.bf16.mxu1 %v1187_v23  ;;  %v1239_v55 = vpack.c.bf16 %v308_v53, %v307_v52  ;;  %v46_v58 = vld [vmem:[%s1608_s0 + $0x8] sm:$0xff]  ;;  %v310_v60 = vld [vmem:[#allocation2 + $0x98] sm:$0xff]  ;;  %v47_v62 = vld [vmem:[%s1608_s0 + $0x10] sm:$0xff]  ;;  %v1211_v0 = vpack.c.bf16 %v294_v57, %v293_v56 }
  0x34   :  { %v52_v61 = vld [vmem:[%s1608_s0 + $0x38] sm:$0xff]  ;;  %v53_v63 = vld [vmem:[%s1608_s0 + $0x40] sm:$0xff]  ;;  %v1243_v1 = vpack.c.bf16 %v310_v60, %v309_v59  ;;  %v296_v3 = vld [vmem:[#allocation2 + $0x28] sm:$0xff] }
  0x35   :  { %1158 = vmatpush3.bf16.msra.mxu0 %v1155_v22  ;;  %v295_v2 = vld [vmem:[#allocation2 + $0x20] sm:$0xff]  ;;  %v48_v4 = vld [vmem:[%s1608_s0 + $0x18] sm:$0xff]  ;;  %v312_v6 = vld [vmem:[#allocation2 + $0xa8] sm:$0xff] }
  0x36   :  { %1190 = vmatpush3.bf16.msra.mxu1 %v1187_v23  ;;  %1160 = vmatprep.subr.bf16.mxu0 %v1159_v30  ;;  %v311_v5 = vld [vmem:[#allocation2 + $0xa0] sm:$0xff]  ;;  %v54_v7 = vld [vmem:[%s1608_s0 + $0x48] sm:$0xff]  ;;  %v55_v9 = vld [vmem:[%s1608_s0 + $0x50] sm:$0xff]  ;;  %v1215_v10 = vpack.c.bf16 %v296_v3, %v295_v2 }
  0x37   :  { %1192 = vmatprep.subr.bf16.mxu1 %v1191_v31  ;;  %v49_v8 = vld [vmem:[%s1608_s0 + $0x20] sm:$0xff]  ;;  %v1247_v11 = vpack.c.bf16 %v312_v6, %v311_v5  ;;  %v297_v12 = vld [vmem:[#allocation2 + $0x30] sm:$0xff]  ;;  %v298_v13 = vld [vmem:[#allocation2 + $0x38] sm:$0xff] }
  0x38   :  { %v50_v14 = vld [vmem:[%s1608_s0 + $0x28] sm:$0xff]  ;;  %v313_v15 = vld [vmem:[#allocation2 + $0xb0] sm:$0xff]  ;;  %v314_v16 = vld [vmem:[#allocation2 + $0xb8] sm:$0xff]  ;;  %v1219_v18 = vpack.c.bf16 %v298_v13, %v297_v12 }
  0x39   :  { %1162 = vmatpush3.bf16.msra.mxu0 %v1159_v30  ;;  %v56_v17 = vld [vmem:[%s1608_s0 + $0x58] sm:$0xff]  ;;  %v1251_v19 = vpack.c.bf16 %v314_v16, %v313_v15  ;;  %v299_v20 = vld [vmem:[#allocation2 + $0x40] sm:$0xff]  ;;  %v300_v21 = vld [vmem:[#allocation2 + $0x48] sm:$0xff] }
  0x3a   :  { %1194 = vmatpush3.bf16.msra.mxu1 %v1191_v31  ;;  %1164 = vmatprep.subr.bf16.mxu0 %v1163_v36  ;;  %v315_v22 = vld [vmem:[#allocation2 + $0xc0] sm:$0xff]  ;;  %v316_v23 = vld [vmem:[#allocation2 + $0xc8] sm:$0xff]  ;;  %v1223_v24 = vpack.c.bf16 %v300_v21, %v299_v20  ;;  %v301_v26 = vld [vmem:[#allocation2 + $0x50] sm:$0xff] }
  0x3b   :  { %1196 = vmatprep.subr.bf16.mxu1 %v1195_v37  ;;  %v1255_v25 = vpack.c.bf16 %v316_v23, %v315_v22  ;;  %v302_v27 = vld [vmem:[#allocation2 + $0x58] sm:$0xff]  ;;  %v317_v28 = vld [vmem:[#allocation2 + $0xd0] sm:$0xff]  ;;  %v303_v32 = vld [vmem:[#allocation2 + $0x60] sm:$0xff] }
  0x3c   :  { %v318_v29 = vld [vmem:[#allocation2 + $0xd8] sm:$0xff]  ;;  %v1227_v30 = vpack.c.bf16 %v302_v27, %v301_v26  ;;  %v304_v33 = vld [vmem:[#allocation2 + $0x68] sm:$0xff]  ;;  %v319_v34 = vld [vmem:[#allocation2 + $0xe0] sm:$0xff] }
  0x3d   :  { %1166 = vmatpush3.bf16.msra.mxu0 %v1163_v36  ;;  %v1259_v31 = vpack.c.bf16 %v318_v29, %v317_v28  ;;  %v320_v35 = vld [vmem:[#allocation2 + $0xe8] sm:$0xff]  ;;  %v1231_v36 = vpack.c.bf16 %v304_v33, %v303_v32  ;;  %v305_v38 = vld [vmem:[#allocation2 + $0x70] sm:$0xff]  ;;  %v306_v39 = vld [vmem:[#allocation2 + $0x78] sm:$0xff] }
  0x3e   :  { %1198 = vmatpush3.bf16.msra.mxu1 %v1195_v37  ;;  %1168 = vmatprep.subr.bf16.mxu0 %v1167_v42  ;;  %v1263_v37 = vpack.c.bf16 %v320_v35, %v319_v34  ;;  %v321_v40 = vld [vmem:[#allocation2 + $0xf0] sm:$0xff]  ;;  %v1235_v41 = vpack.c.bf16 %v306_v39, %v305_v38  ;;  %v525_v44 = vld [vmem:[#allocation4] sm:$0xff]  ;;  %v526_v45 = vld [vmem:[#allocation4 + $0x8] sm:$0xff] }
  0x3f   :  { %1200 = vmatprep.subr.bf16.mxu1 %v1199_v43  ;;  %v541_v46 = vld [vmem:[#allocation4 + $0x80] sm:$0xff]  ;;  %v1271_v47 = vpack.c.bf16 %v526_v45, %v525_v44  ;;  %v527_v51 = vld [vmem:[#allocation4 + $0x10] sm:$0xff]  ;;  %v528_v52 = vld [vmem:[#allocation4 + $0x18] sm:$0xff] }
  0x40   :  { %v544_v56 = vld [vmem:[#allocation4 + $0x98] sm:$0xff]  ;;  %v530_v2 = vld [vmem:[#allocation4 + $0x28] sm:$0xff]  ;;  %v545_v5 = vld [vmem:[#allocation4 + $0xa0] sm:$0xff] }
  0x41   :  { %1170 = vmatpush3.bf16.msra.mxu0 %v1167_v42  ;;  %v322_v42 = vld [vmem:[#allocation2 + $0xf8] sm:$0xff]  ;;  %v546_v6 = vld [vmem:[#allocation4 + $0xa8] sm:$0xff]  ;;  %v531_v15 = vld [vmem:[#allocation4 + $0x30] sm:$0xff] }
  0x42   :  { %1202 = vmatpush3.bf16.msra.mxu1 %v1199_v43  ;;  %1172 = vmatprep.subr.bf16.mxu0 %v1171_v48  ;;  %v1267_v43 = vpack.c.bf16 %v322_v42, %v321_v40  ;;  %v532_v16 = vld [vmem:[#allocation4 + $0x38] sm:$0xff]  ;;  %v533_v28 = vld [vmem:[#allocation4 + $0x40] sm:$0xff]  ;;  %v534_v29 = vld [vmem:[#allocation4 + $0x48] sm:$0xff] }
  0x43   :  { %1204 = vmatprep.subr.bf16.mxu1 %v1203_v49  ;;  %v548_v20 = vld [vmem:[#allocation4 + $0xb8] sm:$0xff]  ;;  %v1287_v32 = vpack.c.bf16 %v534_v29, %v533_v28  ;;  %v535_v34 = vld [vmem:[#allocation4 + $0x50] sm:$0xff]  ;;  %v537_v40 = vld [vmem:[#allocation4 + $0x60] sm:$0xff] }
  0x44   :  { %v536_v35 = vld [vmem:[#allocation4 + $0x58] sm:$0xff]  ;;  %v553_v42 = vld [vmem:[#allocation4 + $0xe0] sm:$0xff] }
  0x45   :  { %1174 = vmatpush3.bf16.msra.mxu0 %v1171_v48  ;;  %v542_v48 = vld [vmem:[#allocation4 + $0x88] sm:$0xff]  ;;  %v1291_v38 = vpack.c.bf16 %v536_v35, %v535_v34 }
  0x46   :  { %1206 = vmatpush3.bf16.msra.mxu1 %v1203_v49  ;;  %1208 = vmatprep.subr.bf16.mxu0 %v1207_v54  ;;  %v1303_v49 = vpack.c.bf16 %v542_v48, %v541_v46  ;;  %v539_v46 = vld [vmem:[#allocation4 + $0x70] sm:$0xff] }
  0x47   :  { %1240 = vmatprep.subr.bf16.mxu1 %v1239_v55  ;;  %v555_v48 = vld [vmem:[#allocation4 + $0xf0] sm:$0xff] }
  0x48   :  { %930 = vmatmul.mubr.f32.vlgmr.msra.gmra.mrb[0].mxu0 %v46_v58 }
  0x49   :  { %971 = vmatmul.mubr.f32.vlgmr.msra.gmra.mrb[0].mxu1 %v52_v61  ;;  %932 = vmatprep.mubr.f32.mxu0 %v47_v62  ;;  %v1275_v61 = vpack.c.bf16 %v528_v52, %v527_v51 }
  0x4a   :  { %973 = vmatprep.mubr.f32.mxu1 %v53_v63  ;;  %1210 = vmatpush3.bf16.msra.mxu0 %v1207_v54 }
  0x4b   :  { %1242 = vmatpush3.bf16.msra.mxu1 %v1239_v55  ;;  %1212 = vmatprep.subr.bf16.mxu0 %v1211_v0  ;;  %v543_v55 = vld [vmem:[#allocation4 + $0x90] sm:$0xff] }
  0x4c   :  { %933 = vmatmul.mubr.f32.gmra.mrb[2].mxu0 %v48_v4  ;;  %1244 = vmatprep.subr.bf16.mxu1 %v1243_v1 }
  0x4d   :  { %974 = vmatmul.mubr.f32.gmra.mrb[2].mxu1 %v54_v7  ;;  %935 = vmatprep.mubr.f32.mxu0 %v49_v8 }
  0x4e   :  { %976 = vmatprep.mubr.f32.mxu1 %v55_v9  ;;  %1214 = vmatpush3.bf16.msra.mxu0 %v1211_v0  ;;  %v1307_v0 = vpack.c.bf16 %v544_v56, %v543_v55 }
  0x4f   :  { %1246 = vmatpush3.bf16.msra.mxu1 %v1243_v1  ;;  %1216 = vmatprep.subr.bf16.mxu0 %v1215_v10  ;;  %v529_v1 = vld [vmem:[#allocation4 + $0x20] sm:$0xff] }
  0x50   :  { %936 = vmatmul.mubr.f32.gmra.mrb[4].mxu0 %v50_v14  ;;  %1248 = vmatprep.subr.bf16.mxu1 %v1247_v11  ;;  %v1311_v14 = vpack.c.bf16 %v546_v6, %v545_v5 }
  0x51   :  { %977 = vmatmul.mubr.f32.gmra.mrb[4].mxu1 %v56_v17 }
  0x52   :  { %1218 = vmatpush3.bf16.msra.mxu0 %v1215_v10 }
  0x53   :  { %1250 = vmatpush3.bf16.msra.mxu1 %v1247_v11  ;;  %1220 = vmatprep.subr.bf16.mxu0 %v1219_v18  ;;  %v1279_v11 = vpack.c.bf16 %v530_v2, %v529_v1 }
  0x54   :  { %1252 = vmatprep.subr.bf16.mxu1 %v1251_v19 }
  0x56   :  { %1222 = vmatpush3.bf16.msra.mxu0 %v1219_v18 }
  0x57   :  { %1254 = vmatpush3.bf16.msra.mxu1 %v1251_v19  ;;  %1224 = vmatprep.subr.bf16.mxu0 %v1223_v24  ;;  %v547_v19 = vld [vmem:[#allocation4 + $0xb0] sm:$0xff] }
  0x58   :  { %1256 = vmatprep.subr.bf16.mxu1 %v1255_v25  ;;  %v1315_v27 = vpack.c.bf16 %v548_v20, %v547_v19 }
  0x5a   :  { %1226 = vmatpush3.bf16.msra.mxu0 %v1223_v24 }
  0x5b   :  { %1258 = vmatpush3.bf16.msra.mxu1 %v1255_v25  ;;  %1228 = vmatprep.subr.bf16.mxu0 %v1227_v30  ;;  %v1283_v25 = vpack.c.bf16 %v532_v16, %v531_v15 }
  0x5c   :  { %1260 = vmatprep.subr.bf16.mxu1 %v1259_v31 }
  0x5e   :  { %1230 = vmatpush3.bf16.msra.mxu0 %v1227_v30  ;;  %v549_v30 = vld [vmem:[#allocation4 + $0xc0] sm:$0xff] }
  0x5f   :  { %1262 = vmatpush3.bf16.msra.mxu1 %v1259_v31  ;;  %1232 = vmatprep.subr.bf16.mxu0 %v1231_v36  ;;  %v550_v31 = vld [vmem:[#allocation4 + $0xc8] sm:$0xff] }
  0x60   :  { %1264 = vmatprep.subr.bf16.mxu1 %v1263_v37  ;;  %v1319_v33 = vpack.c.bf16 %v550_v31, %v549_v30 }
  0x62   :  { %1234 = vmatpush3.bf16.msra.mxu0 %v1231_v36  ;;  %v551_v36 = vld [vmem:[#allocation4 + $0xd0] sm:$0xff] }
  0x63   :  { %1266 = vmatpush3.bf16.msra.mxu1 %v1263_v37  ;;  %1236 = vmatprep.subr.bf16.mxu0 %v1235_v41  ;;  %v552_v37 = vld [vmem:[#allocation4 + $0xd8] sm:$0xff] }
  0x64   :  { %1268 = vmatprep.subr.bf16.mxu1 %v1267_v43  ;;  %v1323_v39 = vpack.c.bf16 %v552_v37, %v551_v36 }
  0x66   :  { %1238 = vmatpush3.bf16.msra.mxu0 %v1235_v41  ;;  %v538_v41 = vld [vmem:[#allocation4 + $0x68] sm:$0xff] }
  0x67   :  { %1270 = vmatpush3.bf16.msra.mxu1 %v1267_v43  ;;  %1272 = vmatprep.subr.bf16.mxu0 %v1271_v47  ;;  %v554_v43 = vld [vmem:[#allocation4 + $0xe8] sm:$0xff]  ;;  %v1295_v44 = vpack.c.bf16 %v538_v41, %v537_v40 }
  0x68   :  { %1304 = vmatprep.subr.bf16.mxu1 %v1303_v49  ;;  %v1327_v45 = vpack.c.bf16 %v554_v43, %v553_v42 }
 0x11b   :  { %v931_v50 = vpop.f32.mrb[0].mxu0 }
 0x11c   :  { %v972_v53 = vpop.f32.mrb[0].mxu1  ;;  %v155_v54 = vpop.f32.mrb[1].mxu0  ;;  %v280_v59 = vmax.f32 %v931_v50, 0.0  ;;  %v556_v50 = vld [vmem:[#allocation4 + $0xf8] sm:$0xff] }
 0x11d   :  { %v279_v57 = vmax.f32 %v155_v54, 0.0  ;;  %v250_v58 = vpop.f32.mrb[1].mxu1  ;;  %v286_v62 = vmax.f32 %v972_v53, 0.0  ;;  %v1331_v51 = vpack.c.bf16 %v556_v50, %v555_v48 }
 0x11e   :  { %v285_v60 = vmax.f32 %v250_v58, 0.0 }
 0x11f   :  { %v934_v63 = vpop.f32.mrb[2].mxu0  ;;  %1011 = vmatprep.mubr.f32.mxu0 %v279_v57 }
 0x120   :  { %v975_v3 = vpop.f32.mrb[2].mxu1  ;;  %1052 = vmatprep.mubr.f32.mxu1 %v285_v60  ;;  %v165_v4 = vpop.f32.mrb[3].mxu0  ;;  %1012 = vmatmul.mubr.f32.vlgmr.msra.gmra.mrb[6].mxu0 %v280_v59  ;;  %v282_v9 = vmax.f32 %v934_v63, 0.0 }
 0x121   :  { %v281_v7 = vmax.f32 %v165_v4, 0.0  ;;  %v260_v8 = vpop.f32.mrb[3].mxu1  ;;  %1053 = vmatmul.mubr.f32.vlgmr.msra.gmra.mrb[6].mxu1 %v286_v62  ;;  %1274 = vmatpush3.bf16.msra.mxu0 %v1271_v47  ;;  %v288_v12 = vmax.f32 %v975_v3, 0.0  ;;  %v540_v47 = vld [vmem:[#allocation4 + $0x78] sm:$0xff] }
 0x122   :  { %v287_v10 = vmax.f32 %v260_v8, 0.0  ;;  %1306 = vmatpush3.bf16.msra.mxu1 %v1303_v49  ;;  %1276 = vmatprep.subr.bf16.mxu0 %v1275_v61  ;;  %v1299_v49 = vpack.c.bf16 %v540_v47, %v539_v46 }
 0x123   :  { %v937_v13 = vpop.f32.mrb[4].mxu0  ;;  %1014 = vmatprep.mubr.f32.mxu0 %v281_v7  ;;  %1308 = vmatprep.subr.bf16.mxu1 %v1307_v0 }
 0x124   :  { %v978_v17 = vpop.f32.mrb[4].mxu1  ;;  %1055 = vmatprep.mubr.f32.mxu1 %v287_v10  ;;  %v175_v18 = vpop.f32.mrb[5].mxu0  ;;  %1015 = vmatmul.mubr.f32.gmra.mrb[8].mxu0 %v282_v9  ;;  %v284_v23 = vmax.f32 %v937_v13, 0.0 }
 0x125   :  { %v283_v21 = vmax.f32 %v175_v18, 0.0  ;;  %v270_v22 = vpop.f32.mrb[5].mxu1  ;;  %1056 = vmatmul.mubr.f32.gmra.mrb[8].mxu1 %v288_v12  ;;  %1278 = vmatpush3.bf16.msra.mxu0 %v1275_v61  ;;  %v290_v26 = vmax.f32 %v978_v17, 0.0 }
 0x126   :  { %v289_v24 = vmax.f32 %v270_v22, 0.0  ;;  %1310 = vmatpush3.bf16.msra.mxu1 %v1307_v0  ;;  %1280 = vmatprep.subr.bf16.mxu0 %v1279_v11 }
 0x127   :  { %1017 = vmatprep.mubr.f32.mxu0 %v283_v21  ;;  %1312 = vmatprep.subr.bf16.mxu1 %v1311_v14 }
 0x128   :  { %1058 = vmatprep.mubr.f32.mxu1 %v289_v24  ;;  %1018 = vmatmul.mubr.f32.gmra.mrb[10].mxu0 %v284_v23 }
 0x129   :  { %1059 = vmatmul.mubr.f32.gmra.mrb[10].mxu1 %v290_v26  ;;  %1282 = vmatpush3.bf16.msra.mxu0 %v1279_v11 }
 0x12a   :  { %1314 = vmatpush3.bf16.msra.mxu1 %v1311_v14  ;;  %1284 = vmatprep.subr.bf16.mxu0 %v1283_v25 }
 0x12b   :  { %1316 = vmatprep.subr.bf16.mxu1 %v1315_v27 }
 0x12d   :  { %1286 = vmatpush3.bf16.msra.mxu0 %v1283_v25 }
 0x12e   :  { %1318 = vmatpush3.bf16.msra.mxu1 %v1315_v27  ;;  %1288 = vmatprep.subr.bf16.mxu0 %v1287_v32 }
 0x12f   :  { %1320 = vmatprep.subr.bf16.mxu1 %v1319_v33 }
 0x131   :  { %1290 = vmatpush3.bf16.msra.mxu0 %v1287_v32 }
 0x132   :  { %1322 = vmatpush3.bf16.msra.mxu1 %v1319_v33  ;;  %1292 = vmatprep.subr.bf16.mxu0 %v1291_v38 }
 0x133   :  { %1324 = vmatprep.subr.bf16.mxu1 %v1323_v39 }
 0x135   :  { %1294 = vmatpush3.bf16.msra.mxu0 %v1291_v38 }
 0x136   :  { %1326 = vmatpush3.bf16.msra.mxu1 %v1323_v39  ;;  %1296 = vmatprep.subr.bf16.mxu0 %v1295_v44 }
 0x137   :  { %1328 = vmatprep.subr.bf16.mxu1 %v1327_v45 }
 0x139   :  { %1298 = vmatpush3.bf16.msra.mxu0 %v1295_v44 }
 0x13a   :  { %1330 = vmatpush3.bf16.msra.mxu1 %v1327_v45  ;;  %1300 = vmatprep.subr.bf16.mxu0 %v1299_v49 }
 0x13b   :  { %1332 = vmatprep.subr.bf16.mxu1 %v1331_v51 }
 0x13d   :  { %1302 = vmatpush3.bf16.msra.mxu0 %v1299_v49 }
 0x13e   :  { %1334 = vmatpush3.bf16.msra.mxu1 %v1331_v51 }
 0x1f3   :  { %v1013_v52 = vpop.f32.mrb[6].mxu0 }
 0x1f4   :  { %v1054_v53 = vpop.f32.mrb[6].mxu1  ;;  %v389_v54 = vpop.f32.mrb[7].mxu0  ;;  %v514_v57 = vmax.f32 %v1013_v52, 0.0 }
 0x1f5   :  { %v513_v55 = vmax.f32 %v389_v54, 0.0  ;;  %v484_v56 = vpop.f32.mrb[7].mxu1  ;;  %v520_v59 = vmax.f32 %v1054_v53, 0.0 }
 0x1f6   :  { %v519_v58 = vmax.f32 %v484_v56, 0.0 }
 0x1f7   :  { %v1016_v60 = vpop.f32.mrb[8].mxu0  ;;  %1093 = vmatprep.mubr.f32.mxu0 %v513_v55 }
 0x1f8   :  { %v1057_v61 = vpop.f32.mrb[8].mxu1  ;;  %1134 = vmatprep.mubr.f32.mxu1 %v519_v58  ;;  %v399_v62 = vpop.f32.mrb[9].mxu0  ;;  %1094 = vmatmul.mubr.f32.vlgmr.msra.gmra.mrb[12].mxu0 %v514_v57  ;;  %v516_v1 = vmax.f32 %v1016_v60, 0.0 }
 0x1f9   :  { %v515_v63 = vmax.f32 %v399_v62, 0.0  ;;  %v494_v0 = vpop.f32.mrb[9].mxu1  ;;  %1135 = vmatmul.mubr.f32.vlgmr.msra.gmra.mrb[12].mxu1 %v520_v59  ;;  %v522_v3 = vmax.f32 %v1057_v61, 0.0 }
 0x1fa   :  { %v521_v2 = vmax.f32 %v494_v0, 0.0 }
 0x1fb   :  { %v1019_v4 = vpop.f32.mrb[10].mxu0  ;;  %1096 = vmatprep.mubr.f32.mxu0 %v515_v63 }
 0x1fc   :  { %v1060_v5 = vpop.f32.mrb[10].mxu1  ;;  %1137 = vmatprep.mubr.f32.mxu1 %v521_v2  ;;  %v409_v6 = vpop.f32.mrb[11].mxu0  ;;  %1097 = vmatmul.mubr.f32.gmra.mrb[14].mxu0 %v516_v1  ;;  %v518_v9 = vmax.f32 %v1019_v4, 0.0 }
 0x1fd   :  { %v517_v7 = vmax.f32 %v409_v6, 0.0  ;;  %v504_v8 = vpop.f32.mrb[11].mxu1  ;;  %1138 = vmatmul.mubr.f32.gmra.mrb[14].mxu1 %v522_v3  ;;  %v524_v11 = vmax.f32 %v1060_v5, 0.0 }
 0x1fe   :  { %v523_v10 = vmax.f32 %v504_v8, 0.0 }
 0x1ff   :  { %1099 = vmatprep.mubr.f32.mxu0 %v517_v7 }
 0x200   :  { %1140 = vmatprep.mubr.f32.mxu1 %v523_v10  ;;  %1100 = vmatmul.mubr.f32.gmra.mrb[16].mxu0 %v518_v9 }
 0x201   :  { %1141 = vmatmul.mubr.f32.gmra.mrb[16].mxu1 %v524_v11 }
 0x2cb   :  { %v1095_v12 = vpop.f32.mrb[12].mxu0 }
 0x2cc   :  { %748 = vst [vmem:[%s1612_s4 + $0x8] sm:$0xff] %v1095_v12  ;;  %v1136_v13 = vpop.f32.mrb[12].mxu1  ;;  %v623_v14 = vpop.f32.mrb[13].mxu0 }
 0x2cd   :  { %754 = vst [vmem:[%s1612_s4 + $0x38] sm:$0xff] %v1136_v13  ;;  %747 = vst [vmem:[%s1612_s4] sm:$0xff] %v623_v14  ;;  %v718_v15 = vpop.f32.mrb[13].mxu1 }
 0x2ce   :  { %753 = vst [vmem:[%s1612_s4 + $0x30] sm:$0xff] %v718_v15 }
 0x2cf   :  { %v1098_v16 = vpop.f32.mrb[14].mxu0 }
 0x2d0   :  { %750 = vst [vmem:[%s1612_s4 + $0x18] sm:$0xff] %v1098_v16  ;;  %v1139_v17 = vpop.f32.mrb[14].mxu1  ;;  %v633_v18 = vpop.f32.mrb[15].mxu0 }
 0x2d1   :  { %756 = vst [vmem:[%s1612_s4 + $0x48] sm:$0xff] %v1139_v17  ;;  %749 = vst [vmem:[%s1612_s4 + $0x10] sm:$0xff] %v633_v18  ;;  %v728_v19 = vpop.f32.mrb[15].mxu1 }
 0x2d2   :  { %755 = vst [vmem:[%s1612_s4 + $0x40] sm:$0xff] %v728_v19 }
 0x2d3   :  { %v1101_v20 = vpop.f32.mrb[16].mxu0 }
 0x2d4   :  { %752 = vst [vmem:[%s1612_s4 + $0x28] sm:$0xff] %v1101_v20  ;;  %v1142_v21 = vpop.f32.mrb[16].mxu1  ;;  %v643_v22 = vpop.f32.mrb[17].mxu0 }
 0x2d5   :  { %758 = vst [vmem:[%s1612_s4 + $0x58] sm:$0xff] %v1142_v21  ;;  %751 = vst [vmem:[%s1612_s4 + $0x20] sm:$0xff] %v643_v22  ;;  %v738_v23 = vpop.f32.mrb[17].mxu1 }
 0x2d6   :  { %757 = vst [vmem:[%s1612_s4 + $0x50] sm:$0xff] %v738_v23 }
 0x2d7   :  { %763 = vsyncpa [#allocation3], 1 }
 0x2d8   :  { %764 = vsyncpa [#allocation5], 1 }

</bundles_post_ra>
